<compile_context>
chip_gen: v6e
topology: v6e:2x2x1
jax: 0.10.0
libtpu: 0.0.40
codegen_flags: <defaults>
</compile_context>

<pallas_src>
import functools
import math

import jax
import jax.numpy as jnp
from jax.experimental import pallas as pl
from jax.experimental.pallas import tpu as pltpu

_LN_EPS = 1e-12
_SQRT_2_OVER_PI = 0.7978845608028654


def _gelu_tanh(x):
    # tanh-approx GELU on the EUP (max abs deviation from exact erf-GELU ~3e-4).
    # TODO(synk): swap in an erf polynomial if bit-parity with torch.erf is required.
    return 0.5 * x * (1.0 + jnp.tanh(_SQRT_2_OVER_PI * (x + 0.044715 * x * x * x)))


def _layernorm(x, gamma, beta):
    # BertLayerNorm: biased variance over the last dim, eps=1e-12 (f32, rsqrt on EUP).
    u = jnp.mean(x, axis=-1, keepdims=True)
    s = jnp.mean((x - u) ** 2, axis=-1, keepdims=True)
    return gamma * (x - u) * jax.lax.rsqrt(s + _LN_EPS) + beta


def _const_spec(block_shape, index_map):
    """Constant-index (weight) block: single-buffered when the API allows it."""
    if hasattr(pl, "Buffered"):
        try:
            return pl.BlockSpec(block_shape, index_map,
                                pipeline_mode=pl.Buffered(1))
        except TypeError:
            pass
    return pl.BlockSpec(block_shape, index_map)


# ---------------------------------------------------------------------------
# Kernel 1: Q / K^T / V projections, computed once per (batch, head-block).
# ---------------------------------------------------------------------------
def _qkv_kernel(nb, dh,
                x_ref, wk_ref, bk_ref, wq_ref, bq_ref, wv_ref, bv_ref,
                q_ref, kt_ref, v_ref):
    x_b = x_ref[0]                                   # (S, H) bf16
    seq = x_b.shape[0]

    # Fused K^T for the whole head-block: (nb*dh, H) x (S, H)^T -> (nb*dh, S).
    kt = jax.lax.dot_general(wk_ref[0], x_b, (((1,), (1,)), ((), ())),
                             preferred_element_type=jnp.float32) + bk_ref[0]
    kt_ref[0] = kt.reshape(nb, dh, seq).astype(jnp.bfloat16)

    # Q (scale pre-folded into weights/bias) and V per head (full-H contraction).
    for i in range(nb):                              # static, nb is small (2-4)
        q_h = jax.lax.dot_general(x_b, wq_ref[i], (((1,), (1,)), ((), ())),
                                  preferred_element_type=jnp.float32) + bq_ref[i]
        v_h = jax.lax.dot_general(x_b, wv_ref[i], (((1,), (1,)), ((), ())),
                                  preferred_element_type=jnp.float32) + bv_ref[i]
        q_ref[0, i] = q_h.astype(jnp.bfloat16)       # (S, dh)
        v_ref[0, i] = v_h.astype(jnp.bfloat16)       # (S, dh)


# ---------------------------------------------------------------------------
# Kernel 2: per-head-block attention + deferred output projection + FFN + LNs.
# ---------------------------------------------------------------------------
def _attn_ffn_kernel(nb, ffn_chunk,
                     xres_ref, mask_ref, q_ref, kt_ref, v_ref,
                     wo_ref, bo_ref, g1_ref, be1_ref,
                     wi_ref, bi_ref, w2_ref, b2_ref, g2_ref, be2_ref,
                     out_ref, acc_ref):
    hb = pl.program_id(2)

    @pl.when(hb == 0)
    def _():
        acc_ref[...] = jnp.zeros_like(acc_ref)

    mask = mask_ref[...]                             # (1, S) additive padding mask

    ctx_parts = []
    for i in range(nb):                              # static loop over heads in block
        q_h = q_ref[0, i]                            # (tq, dh) bf16, 1/sqrt(dh) folded
        kt_h = kt_ref[0, i]                          # (dh, S) bf16
        v_h = v_ref[0, i]                            # (S, dh) bf16
        s = jnp.dot(q_h, kt_h, preferred_element_type=jnp.float32) + mask
        s = s - jnp.max(s, axis=-1, keepdims=True)
        e = jnp.exp(s)
        p = e * pl.reciprocal(jnp.sum(e, axis=-1, keepdims=True), approx=True)
        ctx_parts.append(jnp.dot(p.astype(jnp.bfloat16), v_h,
                                 preferred_element_type=jnp.float32))   # (tq, dh)

    ctx = ctx_parts[0] if nb == 1 else jnp.concatenate(ctx_parts, axis=-1)
    # Fold this head-block's rows of Wo: one nb*dh-deep contraction (>=128 wide
    # for typical BERT head sizes) instead of num_heads shallow dh-deep ones.
    acc_ref[...] += jnp.dot(ctx.astype(jnp.bfloat16), wo_ref[...],
                            preferred_element_type=jnp.float32)         # (tq, H)

    @pl.when(hb == pl.num_programs(2) - 1)
    def _():
        attn = _layernorm(acc_ref[...] + bo_ref[...] + xres_ref[0],
                          g1_ref[...], be1_ref[...])                    # (tq, H) f32
        a_b = attn.astype(jnp.bfloat16)

        # FFN, chunked over the intermediate dim to bound VMEM/vreg pressure.
        inter_dim = wi_ref.shape[-1]
        ffn = jnp.zeros_like(attn)
        for c0 in range(0, inter_dim, ffn_chunk):
            c1 = min(c0 + ffn_chunk, inter_dim)
            mid = jnp.dot(a_b, wi_ref[:, c0:c1],
                          preferred_element_type=jnp.float32) + bi_ref[:, c0:c1]
            ffn = ffn + jnp.dot(_gelu_tanh(mid).astype(jnp.bfloat16),
                                w2_ref[c0:c1, :],
                                preferred_element_type=jnp.float32)
        out = ffn + b2_ref[...]
        out_ref[0] = _layernorm(out + attn, g2_ref[...],
                                be2_ref[...]).astype(out_ref.dtype)


def bert_layer_pallas(x, attention_mask, params, num_heads, *,
                      q_tile=None, heads_per_block=None, ffn_chunk=2048):
    B, S, H = x.shape
    I = params["wi"].shape[1]
    nh = num_heads
    dh = H // nh
    assert H % nh == 0 and dh % 8 == 0, "head size must be a multiple of 8"
    scale = 1.0 / math.sqrt(dh)
    f32, bf16 = jnp.float32, jnp.bfloat16

    # Generation-aware VMEM budget: ~48 MiB on v7x (64 MiB physical per TC),
    # ~96 MiB on v5e/v6e (128 MiB physical).
    try:
        vmem_phys = int(pltpu.get_tpu_info().vmem_capacity_bytes)
    except Exception:
        vmem_phys = 64 << 20
    vmem_limit = int(vmem_phys * 3 // 4)

    if q_tile is None:
        q_tile = 512 if vmem_phys >= (100 << 20) else 256
    tq = min(S, q_tile)
    nq = pl.cdiv(S, tq)

    # Head-block size: the largest divisor of num_heads with nb*dh <= 256
    # (e.g. 4 heads for dh=64 -> 256-wide MXU contractions/outputs).
    if heads_per_block is None:
        heads_per_block = 1
        for d in range(1, nh + 1):
            if nh % d == 0 and d * dh <= max(256, dh):
                heads_per_block = d
    nb = heads_per_block
    assert nh % nb == 0
    nhb = nh // nb
    blk_w = nb * dh

    x_f32 = x.astype(f32)          # residual path only
    x_bf = x_f32.astype(bf16)      # pre-cast activations for the MXU
    # Standard BERT additive padding mask [B,1,1,S] -> [B,S].
    # TODO(synk): per-query masks ([B,1,S,S], e.g. causal) are not supported here.
    mask2d = attention_mask.reshape(B, S).astype(f32)

    def heads_t(w):                # (H, nh*dh) -> (nh, dh, H)
        return jnp.transpose(w.reshape(H, nh, dh), (1, 2, 0))

    wq_t = heads_t(params["wq"] * scale).astype(bf16)            # (nh, dh, H), scale folded
    wv_t = heads_t(params["wv"]).astype(bf16)                    # (nh, dh, H)
    wk_blk = heads_t(params["wk"]).reshape(nhb, blk_w, H).astype(bf16)
    bq_row = (params["bq"] * scale).reshape(nh, 1, dh).astype(f32)
    bv_row = params["bv"].reshape(nh, 1, dh).astype(f32)
    bk_col = params["bk"].reshape(nhb, blk_w, 1).astype(f32)

    wo_b = params["wo"].astype(bf16)                             # (H, H), rows head-major
    wi_b = params["wi"].astype(bf16)                             # (H, I)
    w2_b = params["w2"].astype(bf16)                             # (I, H)
    bo, bi, b2 = (params[k].astype(f32) for k in ("bo", "bi", "b2"))
    g1, be1, g2, be2 = (params[k].astype(f32) for k in ("g1", "be1", "g2", "be2"))

    # ---------------- kernel 1: Q / K^T / V projections (once per batch) -----
    qkv_args = (x_bf, wk_blk, bk_col, wq_t, bq_row, wv_t, bv_row)
    qkv_out_bytes = B * nh * S * dh * 2 * 3
    q_act, kt_act, v_act = pl.pallas_call(
        functools.partial(_qkv_kernel, nb, dh),
        out_shape=(jax.ShapeDtypeStruct((B, nh, S, dh), bf16),   # Q
                   jax.ShapeDtypeStruct((B, nh, dh, S), bf16),   # K^T
                   jax.ShapeDtypeStruct((B, nh, S, dh), bf16)),  # V
        grid=(B, nhb),
        in_specs=[
            pl.BlockSpec((1, S, H), lambda b, h: (b, 0, 0)),         # x (bf16)
            pl.BlockSpec((1, blk_w, H), lambda b, h: (h, 0, 0)),     # Wk (block)
            pl.BlockSpec((1, blk_w, 1), lambda b, h: (h, 0, 0)),     # bk (col)
            pl.BlockSpec((nb, dh, H), lambda b, h: (h, 0, 0)),       # Wq (per head)
            pl.BlockSpec((nb, 1, dh), lambda b, h: (h, 0, 0)),       # bq
            pl.BlockSpec((nb, dh, H), lambda b, h: (h, 0, 0)),       # Wv (per head)
            pl.BlockSpec((nb, 1, dh), lambda b, h: (h, 0, 0)),       # bv
        ],
        out_specs=(
            pl.BlockSpec((1, nb, S, dh), lambda b, h: (b, h, 0, 0)),
            pl.BlockSpec((1, nb, dh, S), lambda b, h: (b, h, 0, 0)),
            pl.BlockSpec((1, nb, S, dh), lambda b, h: (b, h, 0, 0)),
        ),
        compiler_params=pltpu.CompilerParams(
            dimension_semantics=("parallel", "parallel"),
            vmem_limit_bytes=vmem_limit),
        cost_estimate=pl.CostEstimate(
            flops=int(6 * B * S * H * H),
            transcendentals=0,
            bytes_accessed=int(sum(a.size * a.dtype.itemsize for a in qkv_args)
                               + qkv_out_bytes)),
    )(*qkv_args)

    # ---------------- kernel 2: attention + Wo + residual/LN + FFN + LN ------
    attn_args = (x_f32, mask2d, q_act, kt_act, v_act, wo_b, bo, g1, be1,
                 wi_b, bi, w2_b, b2, g2, be2)
    in_specs = [
        pl.BlockSpec((1, tq, H), lambda b, q, h: (b, q, 0)),         # x residual (f32)
        pl.BlockSpec((1, S), lambda b, q, h: (b, 0)),                # additive mask
        pl.BlockSpec((1, nb, tq, dh), lambda b, q, h: (b, h, q, 0)),  # Q
        pl.BlockSpec((1, nb, dh, S), lambda b, q, h: (b, h, 0, 0)),   # K^T
        pl.BlockSpec((1, nb, S, dh), lambda b, q, h: (b, h, 0, 0)),   # V
        pl.BlockSpec((blk_w, H), lambda b, q, h: (h, 0)),             # Wo rows (block)
        _const_spec((1, H), lambda b, q, h: (0, 0)),                  # bo
        _const_spec((1, H), lambda b, q, h: (0, 0)),                  # LN1 gamma
        _const_spec((1, H), lambda b, q, h: (0, 0)),                  # LN1 beta
        _const_spec((H, I), lambda b, q, h: (0, 0)),                  # Wi
        _const_spec((1, I), lambda b, q, h: (0, 0)),                  # bi
        _const_spec((I, H), lambda b, q, h: (0, 0)),                  # W2
        _const_spec((1, H), lambda b, q, h: (0, 0)),                  # b2
        _const_spec((1, H), lambda b, q, h: (0, 0)),                  # LN2 gamma
        _const_spec((1, H), lambda b, q, h: (0, 0)),                  # LN2 beta
    ]
    cost = pl.CostEstimate(
        flops=int(B * (4 * S * S * H + 2 * S * H * H + 4 * S * H * I)),
        transcendentals=int(B * (nh * S * S + S * I)),
        bytes_accessed=int(sum(a.size * a.dtype.itemsize for a in attn_args)
                           + B * S * H * 4))

    # Note (v7x): keep B*nq >= 2 where possible so both TensorCores get work.
    return pl.pallas_call(
        functools.partial(_attn_ffn_kernel, nb, int(ffn_chunk)),
        out_shape=jax.ShapeDtypeStruct((B, S, H), jnp.float32),
        grid=(B, nq, nhb),
        in_specs=in_specs,
        out_specs=pl.BlockSpec((1, tq, H), lambda b, q, h: (b, q, 0)),
        scratch_shapes=[pltpu.VMEM((tq, H), jnp.float32)],
        compiler_params=pltpu.CompilerParams(
            dimension_semantics=("parallel", "parallel", "arbitrary"),
            vmem_limit_bytes=vmem_limit),
        cost_estimate=cost,
    )(*attn_args)


def bert_layer_ref(x, attention_mask, params, num_heads):
    # Pure-JAX f32 reference mirroring the PyTorch forward exactly (eval mode).
    B, S, H = x.shape
    dh = H // num_heads
    hi = jax.lax.Precision.HIGHEST

    def lin(h, w, b):
        return jnp.einsum("bsh,hk->bsk", h, w, precision=hi) + b

    def ln(z, g, b):
        u = jnp.mean(z, axis=-1, keepdims=True)
        s = jnp.mean((z - u) ** 2, axis=-1, keepdims=True)
        return g * (z - u) / jnp.sqrt(s + _LN_EPS) + b

    q = lin(x, params["wq"], params["bq"]).reshape(B, S, num_heads, dh)
    k = lin(x, params["wk"], params["bk"]).reshape(B, S, num_heads, dh)
    v = lin(x, params["wv"], params["bv"]).reshape(B, S, num_heads, dh)
    scores = jnp.einsum("bqhd,bkhd->bhqk", q, k, precision=hi) / math.sqrt(dh)
    scores = scores + attention_mask
    probs = jax.nn.softmax(scores, axis=-1)
    ctx = jnp.einsum("bhqk,bkhd->bqhd", probs, v, precision=hi).reshape(B, S, H)

    attn_out = ln(lin(ctx, params["wo"], params["bo"]) + x,
                  params["g1"], params["be1"])
    hmid = lin(attn_out, params["wi"], params["bi"])
    inter = hmid * 0.5 * (1.0 + jax.scipy.special.erf(hmid / math.sqrt(2.0)))
    out = lin(inter, params["w2"], params["b2"])
    return ln(out + attn_out, params["g2"], params["be2"])


if __name__ == "__main__":
    B, S, H, NH, I = 2, 8, 32, 4, 128   # batch, seq, hidden, heads, intermediate

    key = jax.random.PRNGKey(0)
    ks = jax.random.split(key, 20)
    nrm = lambda k, shp, s=0.02: (s * jax.random.normal(k, shp)).astype(jnp.float32)

    params = dict(
        wq=nrm(ks[0], (H, H)), bq=nrm(ks[1], (1, H)),
        wk=nrm(ks[2], (H, H)), bk=nrm(ks[3], (1, H)),
        wv=nrm(ks[4], (H, H)), bv=nrm(ks[5], (1, H)),
        wo=nrm(ks[6], (H, H)), bo=nrm(ks[7], (1, H)),
        g1=(jnp.ones((1, H), jnp.float32) + nrm(ks[8], (1, H), 0.1)),
        be1=nrm(ks[9], (1, H), 0.1),
        wi=nrm(ks[10], (H, I)), bi=nrm(ks[11], (1, I)),
        w2=nrm(ks[12], (I, H)), b2=nrm(ks[13], (1, H)),
        g2=(jnp.ones((1, H), jnp.float32) + nrm(ks[14], (1, H), 0.1)),
        be2=nrm(ks[15], (1, H), 0.1),
    )

    x = jax.random.normal(ks[16], (B, S, H), jnp.float32)
    # BERT-style additive mask; last two positions of batch 1 are padding.
    valid = jnp.ones((B, S), jnp.float32).at[1, -2:].set(0.0)
    attention_mask = (1.0 - valid)[:, None, None, :] * -10000.0   # (B,1,1,S)

    out = jax.block_until_ready(bert_layer_pallas(x, attention_mask, params, NH))
    ref = bert_layer_ref(x, attention_mask, params, NH)

    assert out.shape == (B, S, H)
    max_err = float(jnp.max(jnp.abs(out - ref)))
    # bf16 MXU matmuls + approx reciprocal / tanh-GELU -> loosened tolerance vs f32 ref.
    assert jnp.allclose(out, ref, atol=2e-2, rtol=2e-2), f"max_err={max_err}"
    print("KERNEL_OK")
</pallas_src>

<mosaic_0001>
module attributes {stable_mosaic.version = 11 : i64} {
  func.func @_qkv_kernel(%arg0: i32, %arg1: i32, %arg2: memref<1x8x32xbf16, #tpu.memory_space<vmem>>, %arg3: memref<1x32x32xbf16, #tpu.memory_space<vmem>>, %arg4: memref<1x32x1xf32, #tpu.memory_space<vmem>>, %arg5: memref<4x8x32xbf16, #tpu.memory_space<vmem>>, %arg6: memref<4x1x8xf32, #tpu.memory_space<vmem>>, %arg7: memref<4x8x32xbf16, #tpu.memory_space<vmem>>, %arg8: memref<4x1x8xf32, #tpu.memory_space<vmem>>, %arg9: memref<1x4x8x8xbf16, #tpu.memory_space<vmem>>, %arg10: memref<1x4x8x8xbf16, #tpu.memory_space<vmem>>, %arg11: memref<1x4x8x8xbf16, #tpu.memory_space<vmem>>) attributes {dimension_semantics = [#tpu.dimension_semantics<parallel>, #tpu.dimension_semantics<parallel>], iteration_bounds = array<i64: 2, 1>, scalar_prefetch = 0 : i64, scratch_operands = 0 : i64, tpu.core_type = #tpu.core_type<tc>, window_params = [{transform_indices = @transform_0, window_bounds = array<i64: 1, 8, 32>}, {transform_indices = @transform_1, window_bounds = array<i64: 1, 32, 32>}, {transform_indices = @transform_2, window_bounds = array<i64: 1, 32, 1>}, {transform_indices = @transform_3, window_bounds = array<i64: 4, 8, 32>}, {transform_indices = @transform_4, window_bounds = array<i64: 4, 1, 8>}, {transform_indices = @transform_5, window_bounds = array<i64: 4, 8, 32>}, {transform_indices = @transform_6, window_bounds = array<i64: 4, 1, 8>}, {transform_indices = @transform_7, window_bounds = array<i64: 1, 4, 8, 8>}, {transform_indices = @transform_8, window_bounds = array<i64: 1, 4, 8, 8>}, {transform_indices = @transform_9, window_bounds = array<i64: 1, 4, 8, 8>}]} {
    %c0 = arith.constant 0 : index
    %c0_0 = arith.constant 0 : index
    %c0_1 = arith.constant 0 : index
    %0 = vector.load %arg2[%c0, %c0_0, %c0_1] : memref<1x8x32xbf16, #tpu.memory_space<vmem>>, vector<1x8x32xbf16>
    %1 = vector.shape_cast %0 : vector<1x8x32xbf16> to vector<8x32xbf16>
    %c0_2 = arith.constant 0 : index
    %c0_3 = arith.constant 0 : index
    %c0_4 = arith.constant 0 : index
    %2 = vector.load %arg3[%c0_2, %c0_3, %c0_4] : memref<1x32x32xbf16, #tpu.memory_space<vmem>>, vector<1x32x32xbf16>
    %3 = vector.shape_cast %2 : vector<1x32x32xbf16> to vector<32x32xbf16>
    %cst = arith.constant dense<0.000000e+00> : vector<32x8xf32>
    %4 = tpu.matmul %3, %1, %cst {dimension_numbers = #tpu.dot_dimension_numbers<[1], [1], [0], [0], [0, 0, 1, 0], [], []>} : vector<32x32xbf16>, vector<8x32xbf16>, vector<32x8xf32> -> vector<32x8xf32>
    %c0_5 = arith.constant 0 : index
    %c0_6 = arith.constant 0 : index
    %c0_7 = arith.constant 0 : index
    %5 = vector.load %arg4[%c0_5, %c0_6, %c0_7] : memref<1x32x1xf32, #tpu.memory_space<vmem>>, vector<1x32x1xf32>
    %6 = vector.shape_cast %5 : vector<1x32x1xf32> to vector<32x1xf32>
    %7 = vector.broadcast %6 : vector<32x1xf32> to vector<32x8xf32>
    %8 = arith.addf %4, %7 : vector<32x8xf32>
    %9 = vector.shape_cast %8 : vector<32x8xf32> to vector<4x8x8xf32>
    %10 = arith.truncf %9 : vector<4x8x8xf32> to vector<4x8x8xbf16>
    %c0_8 = arith.constant 0 : index
    %c0_9 = arith.constant 0 : index
    %c0_10 = arith.constant 0 : index
    %c0_11 = arith.constant 0 : index
    %11 = vector.load %arg10[%c0_8, %c0_9, %c0_10, %c0_11] : memref<1x4x8x8xbf16, #tpu.memory_space<vmem>>, vector<1x4x8x8xbf16>
    %12 = vector.shape_cast %11 : vector<1x4x8x8xbf16> to vector<4x8x8xbf16>
    %13 = vector.shape_cast %10 : vector<4x8x8xbf16> to vector<1x4x8x8xbf16>
    tpu.vector_store %arg10[%c0_8, %c0_9, %c0_10, %c0_11], %13 {strides = array<i32>} : memref<1x4x8x8xbf16, #tpu.memory_space<vmem>>, vector<1x4x8x8xbf16>,
    %c0_12 = arith.constant 0 : index
    %c0_13 = arith.constant 0 : index
    %c0_14 = arith.constant 0 : index
    %14 = vector.load %arg5[%c0_12, %c0_13, %c0_14] : memref<4x8x32xbf16, #tpu.memory_space<vmem>>, vector<1x8x32xbf16>
    %15 = vector.shape_cast %14 : vector<1x8x32xbf16> to vector<8x32xbf16>
    %cst_15 = arith.constant dense<0.000000e+00> : vector<8x8xf32>
    %16 = tpu.matmul %1, %15, %cst_15 {dimension_numbers = #tpu.dot_dimension_numbers<[1], [1], [0], [0], [0, 0, 1, 0], [], []>} : vector<8x32xbf16>, vector<8x32xbf16>, vector<8x8xf32> -> vector<8x8xf32>
    %c0_16 = arith.constant 0 : index
    %c0_17 = arith.constant 0 : index
    %c0_18 = arith.constant 0 : index
    %17 = vector.load %arg6[%c0_16, %c0_17, %c0_18] : memref<4x1x8xf32, #tpu.memory_space<vmem>>, vector<1x1x8xf32>
    %18 = vector.shape_cast %17 : vector<1x1x8xf32> to vector<1x8xf32>
    %19 = vector.broadcast %18 : vector<1x8xf32> to vector<8x8xf32>
    %20 = arith.addf %16, %19 : vector<8x8xf32>
    %c0_19 = arith.constant 0 : index
    %c0_20 = arith.constant 0 : index
    %c0_21 = arith.constant 0 : index
    %21 = vector.load %arg7[%c0_19, %c0_20, %c0_21] : memref<4x8x32xbf16, #tpu.memory_space<vmem>>, vector<1x8x32xbf16>
    %22 = vector.shape_cast %21 : vector<1x8x32xbf16> to vector<8x32xbf16>
    %cst_22 = arith.constant dense<0.000000e+00> : vector<8x8xf32>
    %23 = tpu.matmul %1, %22, %cst_22 {dimension_numbers = #tpu.dot_dimension_numbers<[1], [1], [0], [0], [0, 0, 1, 0], [], []>} : vector<8x32xbf16>, vector<8x32xbf16>, vector<8x8xf32> -> vector<8x8xf32>
    %c0_23 = arith.constant 0 : index
    %c0_24 = arith.constant 0 : index
    %c0_25 = arith.constant 0 : index
    %24 = vector.load %arg8[%c0_23, %c0_24, %c0_25] : memref<4x1x8xf32, #tpu.memory_space<vmem>>, vector<1x1x8xf32>
    %25 = vector.shape_cast %24 : vector<1x1x8xf32> to vector<1x8xf32>
    %26 = vector.broadcast %25 : vector<1x8xf32> to vector<8x8xf32>
    %27 = arith.addf %23, %26 : vector<8x8xf32>
    %28 = arith.truncf %20 : vector<8x8xf32> to vector<8x8xbf16>
    %c0_26 = arith.constant 0 : index
    %c0_27 = arith.constant 0 : index
    %c0_28 = arith.constant 0 : index
    %c0_29 = arith.constant 0 : index
    %29 = vector.load %arg9[%c0_26, %c0_27, %c0_28, %c0_29] : memref<1x4x8x8xbf16, #tpu.memory_space<vmem>>, vector<1x1x8x8xbf16>
    %30 = vector.shape_cast %29 : vector<1x1x8x8xbf16> to vector<8x8xbf16>
    %31 = vector.shape_cast %28 : vector<8x8xbf16> to vector<1x1x8x8xbf16>
    tpu.vector_store %arg9[%c0_26, %c0_27, %c0_28, %c0_29], %31 {strides = array<i32>} : memref<1x4x8x8xbf16, #tpu.memory_space<vmem>>, vector<1x1x8x8xbf16>,
    %32 = arith.truncf %27 : vector<8x8xf32> to vector<8x8xbf16>
    %c0_30 = arith.constant 0 : index
    %c0_31 = arith.constant 0 : index
    %c0_32 = arith.constant 0 : index
    %c0_33 = arith.constant 0 : index
    %33 = vector.load %arg11[%c0_30, %c0_31, %c0_32, %c0_33] : memref<1x4x8x8xbf16, #tpu.memory_space<vmem>>, vector<1x1x8x8xbf16>
    %34 = vector.shape_cast %33 : vector<1x1x8x8xbf16> to vector<8x8xbf16>
    %35 = vector.shape_cast %32 : vector<8x8xbf16> to vector<1x1x8x8xbf16>
    tpu.vector_store %arg11[%c0_30, %c0_31, %c0_32, %c0_33], %35 {strides = array<i32>} : memref<1x4x8x8xbf16, #tpu.memory_space<vmem>>, vector<1x1x8x8xbf16>,
    %c1 = arith.constant 1 : index
    %c0_34 = arith.constant 0 : index
    %c0_35 = arith.constant 0 : index
    %36 = vector.load %arg5[%c1, %c0_34, %c0_35] : memref<4x8x32xbf16, #tpu.memory_space<vmem>>, vector<1x8x32xbf16>
    %37 = vector.shape_cast %36 : vector<1x8x32xbf16> to vector<8x32xbf16>
    %cst_36 = arith.constant dense<0.000000e+00> : vector<8x8xf32>
    %38 = tpu.matmul %1, %37, %cst_36 {dimension_numbers = #tpu.dot_dimension_numbers<[1], [1], [0], [0], [0, 0, 1, 0], [], []>} : vector<8x32xbf16>, vector<8x32xbf16>, vector<8x8xf32> -> vector<8x8xf32>
    %c1_37 = arith.constant 1 : index
    %c0_38 = arith.constant 0 : index
    %c0_39 = arith.constant 0 : index
    %39 = vector.load %arg6[%c1_37, %c0_38, %c0_39] : memref<4x1x8xf32, #tpu.memory_space<vmem>>, vector<1x1x8xf32>
    %40 = vector.shape_cast %39 : vector<1x1x8xf32> to vector<1x8xf32>
    %41 = vector.broadcast %40 : vector<1x8xf32> to vector<8x8xf32>
    %42 = arith.addf %38, %41 : vector<8x8xf32>
    %c1_40 = arith.constant 1 : index
    %c0_41 = arith.constant 0 : index
    %c0_42 = arith.constant 0 : index
    %43 = vector.load %arg7[%c1_40, %c0_41, %c0_42] : memref<4x8x32xbf16, #tpu.memory_space<vmem>>, vector<1x8x32xbf16>
    %44 = vector.shape_cast %43 : vector<1x8x32xbf16> to vector<8x32xbf16>
    %cst_43 = arith.constant dense<0.000000e+00> : vector<8x8xf32>
    %45 = tpu.matmul %1, %44, %cst_43 {dimension_numbers = #tpu.dot_dimension_numbers<[1], [1], [0], [0], [0, 0, 1, 0], [], []>} : vector<8x32xbf16>, vector<8x32xbf16>, vector<8x8xf32> -> vector<8x8xf32>
    %c1_44 = arith.constant 1 : index
    %c0_45 = arith.constant 0 : index
    %c0_46 = arith.constant 0 : index
    %46 = vector.load %arg8[%c1_44, %c0_45, %c0_46] : memref<4x1x8xf32, #tpu.memory_space<vmem>>, vector<1x1x8xf32>
    %47 = vector.shape_cast %46 : vector<1x1x8xf32> to vector<1x8xf32>
    %48 = vector.broadcast %47 : vector<1x8xf32> to vector<8x8xf32>
    %49 = arith.addf %45, %48 : vector<8x8xf32>
    %50 = arith.truncf %42 : vector<8x8xf32> to vector<8x8xbf16>
    %c0_47 = arith.constant 0 : index
    %c1_48 = arith.constant 1 : index
    %c0_49 = arith.constant 0 : index
    %c0_50 = arith.constant 0 : index
    %51 = vector.load %arg9[%c0_47, %c1_48, %c0_49, %c0_50] : memref<1x4x8x8xbf16, #tpu.memory_space<vmem>>, vector<1x1x8x8xbf16>
    %52 = vector.shape_cast %51 : vector<1x1x8x8xbf16> to vector<8x8xbf16>
    %53 = vector.shape_cast %50 : vector<8x8xbf16> to vector<1x1x8x8xbf16>
    tpu.vector_store %arg9[%c0_47, %c1_48, %c0_49, %c0_50], %53 {strides = array<i32>} : memref<1x4x8x8xbf16, #tpu.memory_space<vmem>>, vector<1x1x8x8xbf16>,
    %54 = arith.truncf %49 : vector<8x8xf32> to vector<8x8xbf16>
    %c0_51 = arith.constant 0 : index
    %c1_52 = arith.constant 1 : index
    %c0_53 = arith.constant 0 : index
    %c0_54 = arith.constant 0 : index
    %55 = vector.load %arg11[%c0_51, %c1_52, %c0_53, %c0_54] : memref<1x4x8x8xbf16, #tpu.memory_space<vmem>>, vector<1x1x8x8xbf16>
    %56 = vector.shape_cast %55 : vector<1x1x8x8xbf16> to vector<8x8xbf16>
    %57 = vector.shape_cast %54 : vector<8x8xbf16> to vector<1x1x8x8xbf16>
    tpu.vector_store %arg11[%c0_51, %c1_52, %c0_53, %c0_54], %57 {strides = array<i32>} : memref<1x4x8x8xbf16, #tpu.memory_space<vmem>>, vector<1x1x8x8xbf16>,
    %c2 = arith.constant 2 : index
    %c0_55 = arith.constant 0 : index
    %c0_56 = arith.constant 0 : index
    %58 = vector.load %arg5[%c2, %c0_55, %c0_56] : memref<4x8x32xbf16, #tpu.memory_space<vmem>>, vector<1x8x32xbf16>
    %59 = vector.shape_cast %58 : vector<1x8x32xbf16> to vector<8x32xbf16>
    %cst_57 = arith.constant dense<0.000000e+00> : vector<8x8xf32>
    %60 = tpu.matmul %1, %59, %cst_57 {dimension_numbers = #tpu.dot_dimension_numbers<[1], [1], [0], [0], [0, 0, 1, 0], [], []>} : vector<8x32xbf16>, vector<8x32xbf16>, vector<8x8xf32> -> vector<8x8xf32>
    %c2_58 = arith.constant 2 : index
    %c0_59 = arith.constant 0 : index
    %c0_60 = arith.constant 0 : index
    %61 = vector.load %arg6[%c2_58, %c0_59, %c0_60] : memref<4x1x8xf32, #tpu.memory_space<vmem>>, vector<1x1x8xf32>
    %62 = vector.shape_cast %61 : vector<1x1x8xf32> to vector<1x8xf32>
    %63 = vector.broadcast %62 : vector<1x8xf32> to vector<8x8xf32>
    %64 = arith.addf %60, %63 : vector<8x8xf32>
    %c2_61 = arith.constant 2 : index
    %c0_62 = arith.constant 0 : index
    %c0_63 = arith.constant 0 : index
    %65 = vector.load %arg7[%c2_61, %c0_62, %c0_63] : memref<4x8x32xbf16, #tpu.memory_space<vmem>>, vector<1x8x32xbf16>
    %66 = vector.shape_cast %65 : vector<1x8x32xbf16> to vector<8x32xbf16>
    %cst_64 = arith.constant dense<0.000000e+00> : vector<8x8xf32>
    %67 = tpu.matmul %1, %66, %cst_64 {dimension_numbers = #tpu.dot_dimension_numbers<[1], [1], [0], [0], [0, 0, 1, 0], [], []>} : vector<8x32xbf16>, vector<8x32xbf16>, vector<8x8xf32> -> vector<8x8xf32>
    %c2_65 = arith.constant 2 : index
    %c0_66 = arith.constant 0 : index
    %c0_67 = arith.constant 0 : index
    %68 = vector.load %arg8[%c2_65, %c0_66, %c0_67] : memref<4x1x8xf32, #tpu.memory_space<vmem>>, vector<1x1x8xf32>
    %69 = vector.shape_cast %68 : vector<1x1x8xf32> to vector<1x8xf32>
    %70 = vector.broadcast %69 : vector<1x8xf32> to vector<8x8xf32>
    %71 = arith.addf %67, %70 : vector<8x8xf32>
    %72 = arith.truncf %64 : vector<8x8xf32> to vector<8x8xbf16>
    %c0_68 = arith.constant 0 : index
    %c2_69 = arith.constant 2 : index
    %c0_70 = arith.constant 0 : index
    %c0_71 = arith.constant 0 : index
    %73 = vector.load %arg9[%c0_68, %c2_69, %c0_70, %c0_71] : memref<1x4x8x8xbf16, #tpu.memory_space<vmem>>, vector<1x1x8x8xbf16>
    %74 = vector.shape_cast %73 : vector<1x1x8x8xbf16> to vector<8x8xbf16>
    %75 = vector.shape_cast %72 : vector<8x8xbf16> to vector<1x1x8x8xbf16>
    tpu.vector_store %arg9[%c0_68, %c2_69, %c0_70, %c0_71], %75 {strides = array<i32>} : memref<1x4x8x8xbf16, #tpu.memory_space<vmem>>, vector<1x1x8x8xbf16>,
    %76 = arith.truncf %71 : vector<8x8xf32> to vector<8x8xbf16>
    %c0_72 = arith.constant 0 : index
    %c2_73 = arith.constant 2 : index
    %c0_74 = arith.constant 0 : index
    %c0_75 = arith.constant 0 : index
    %77 = vector.load %arg11[%c0_72, %c2_73, %c0_74, %c0_75] : memref<1x4x8x8xbf16, #tpu.memory_space<vmem>>, vector<1x1x8x8xbf16>
    %78 = vector.shape_cast %77 : vector<1x1x8x8xbf16> to vector<8x8xbf16>
    %79 = vector.shape_cast %76 : vector<8x8xbf16> to vector<1x1x8x8xbf16>
    tpu.vector_store %arg11[%c0_72, %c2_73, %c0_74, %c0_75], %79 {strides = array<i32>} : memref<1x4x8x8xbf16, #tpu.memory_space<vmem>>, vector<1x1x8x8xbf16>,
    %c3 = arith.constant 3 : index
    %c0_76 = arith.constant 0 : index
    %c0_77 = arith.constant 0 : index
    %80 = vector.load %arg5[%c3, %c0_76, %c0_77] : memref<4x8x32xbf16, #tpu.memory_space<vmem>>, vector<1x8x32xbf16>
    %81 = vector.shape_cast %80 : vector<1x8x32xbf16> to vector<8x32xbf16>
    %cst_78 = arith.constant dense<0.000000e+00> : vector<8x8xf32>
    %82 = tpu.matmul %1, %81, %cst_78 {dimension_numbers = #tpu.dot_dimension_numbers<[1], [1], [0], [0], [0, 0, 1, 0], [], []>} : vector<8x32xbf16>, vector<8x32xbf16>, vector<8x8xf32> -> vector<8x8xf32>
    %c3_79 = arith.constant 3 : index
    %c0_80 = arith.constant 0 : index
    %c0_81 = arith.constant 0 : index
    %83 = vector.load %arg6[%c3_79, %c0_80, %c0_81] : memref<4x1x8xf32, #tpu.memory_space<vmem>>, vector<1x1x8xf32>
    %84 = vector.shape_cast %83 : vector<1x1x8xf32> to vector<1x8xf32>
    %85 = vector.broadcast %84 : vector<1x8xf32> to vector<8x8xf32>
    %86 = arith.addf %82, %85 : vector<8x8xf32>
    %c3_82 = arith.constant 3 : index
    %c0_83 = arith.constant 0 : index
    %c0_84 = arith.constant 0 : index
    %87 = vector.load %arg7[%c3_82, %c0_83, %c0_84] : memref<4x8x32xbf16, #tpu.memory_space<vmem>>, vector<1x8x32xbf16>
    %88 = vector.shape_cast %87 : vector<1x8x32xbf16> to vector<8x32xbf16>
    %cst_85 = arith.constant dense<0.000000e+00> : vector<8x8xf32>
    %89 = tpu.matmul %1, %88, %cst_85 {dimension_numbers = #tpu.dot_dimension_numbers<[1], [1], [0], [0], [0, 0, 1, 0], [], []>} : vector<8x32xbf16>, vector<8x32xbf16>, vector<8x8xf32> -> vector<8x8xf32>
    %c3_86 = arith.constant 3 : index
    %c0_87 = arith.constant 0 : index
    %c0_88 = arith.constant 0 : index
    %90 = vector.load %arg8[%c3_86, %c0_87, %c0_88] : memref<4x1x8xf32, #tpu.memory_space<vmem>>, vector<1x1x8xf32>
    %91 = vector.shape_cast %90 : vector<1x1x8xf32> to vector<1x8xf32>
    %92 = vector.broadcast %91 : vector<1x8xf32> to vector<8x8xf32>
    %93 = arith.addf %89, %92 : vector<8x8xf32>
    %94 = arith.truncf %86 : vector<8x8xf32> to vector<8x8xbf16>
    %c0_89 = arith.constant 0 : index
    %c3_90 = arith.constant 3 : index
    %c0_91 = arith.constant 0 : index
    %c0_92 = arith.constant 0 : index
    %95 = vector.load %arg9[%c0_89, %c3_90, %c0_91, %c0_92] : memref<1x4x8x8xbf16, #tpu.memory_space<vmem>>, vector<1x1x8x8xbf16>
    %96 = vector.shape_cast %95 : vector<1x1x8x8xbf16> to vector<8x8xbf16>
    %97 = vector.shape_cast %94 : vector<8x8xbf16> to vector<1x1x8x8xbf16>
    tpu.vector_store %arg9[%c0_89, %c3_90, %c0_91, %c0_92], %97 {strides = array<i32>} : memref<1x4x8x8xbf16, #tpu.memory_space<vmem>>, vector<1x1x8x8xbf16>,
    %98 = arith.truncf %93 : vector<8x8xf32> to vector<8x8xbf16>
    %c0_93 = arith.constant 0 : index
    %c3_94 = arith.constant 3 : index
    %c0_95 = arith.constant 0 : index
    %c0_96 = arith.constant 0 : index
    %99 = vector.load %arg11[%c0_93, %c3_94, %c0_95, %c0_96] : memref<1x4x8x8xbf16, #tpu.memory_space<vmem>>, vector<1x1x8x8xbf16>
    %100 = vector.shape_cast %99 : vector<1x1x8x8xbf16> to vector<8x8xbf16>
    %101 = vector.shape_cast %98 : vector<8x8xbf16> to vector<1x1x8x8xbf16>
    tpu.vector_store %arg11[%c0_93, %c3_94, %c0_95, %c0_96], %101 {strides = array<i32>} : memref<1x4x8x8xbf16, #tpu.memory_space<vmem>>, vector<1x1x8x8xbf16>,
    return
  }
  func.func @transform_0(%arg0: i32, %arg1: i32) -> (i32, i32, i32) {
    %c0_i32 = arith.constant 0 : i32
    %c0_i32_0 = arith.constant 0 : i32
    %c0_i32_1 = arith.constant 0 : i32
    return %arg0, %c0_i32, %c0_i32_0 : i32, i32, i32
  }
  func.func @transform_1(%arg0: i32, %arg1: i32) -> (i32, i32, i32) {
    %c0_i32 = arith.constant 0 : i32
    %c0_i32_0 = arith.constant 0 : i32
    %c0_i32_1 = arith.constant 0 : i32
    return %arg1, %c0_i32, %c0_i32_0 : i32, i32, i32
  }
  func.func @transform_2(%arg0: i32, %arg1: i32) -> (i32, i32, i32) {
    %c0_i32 = arith.constant 0 : i32
    %c0_i32_0 = arith.constant 0 : i32
    %c0_i32_1 = arith.constant 0 : i32
    return %arg1, %c0_i32, %c0_i32_0 : i32, i32, i32
  }
  func.func @transform_3(%arg0: i32, %arg1: i32) -> (i32, i32, i32) {
    %c0_i32 = arith.constant 0 : i32
    %c0_i32_0 = arith.constant 0 : i32
    %c0_i32_1 = arith.constant 0 : i32
    return %arg1, %c0_i32, %c0_i32_0 : i32, i32, i32
  }
  func.func @transform_4(%arg0: i32, %arg1: i32) -> (i32, i32, i32) {
    %c0_i32 = arith.constant 0 : i32
    %c0_i32_0 = arith.constant 0 : i32
    %c0_i32_1 = arith.constant 0 : i32
    return %arg1, %c0_i32, %c0_i32_0 : i32, i32, i32
  }
  func.func @transform_5(%arg0: i32, %arg1: i32) -> (i32, i32, i32) {
    %c0_i32 = arith.constant 0 : i32
    %c0_i32_0 = arith.constant 0 : i32
    %c0_i32_1 = arith.constant 0 : i32
    return %arg1, %c0_i32, %c0_i32_0 : i32, i32, i32
  }
  func.func @transform_6(%arg0: i32, %arg1: i32) -> (i32, i32, i32) {
    %c0_i32 = arith.constant 0 : i32
    %c0_i32_0 = arith.constant 0 : i32
    %c0_i32_1 = arith.constant 0 : i32
    return %arg1, %c0_i32, %c0_i32_0 : i32, i32, i32
  }
  func.func @transform_7(%arg0: i32, %arg1: i32) -> (i32, i32, i32, i32) {
    %c0_i32 = arith.constant 0 : i32
    %c0_i32_0 = arith.constant 0 : i32
    %c0_i32_1 = arith.constant 0 : i32
    return %arg0, %arg1, %c0_i32, %c0_i32_0 : i32, i32, i32, i32
  }
  func.func @transform_8(%arg0: i32, %arg1: i32) -> (i32, i32, i32, i32) {
    %c0_i32 = arith.constant 0 : i32
    %c0_i32_0 = arith.constant 0 : i32
    %c0_i32_1 = arith.constant 0 : i32
    return %arg0, %arg1, %c0_i32, %c0_i32_0 : i32, i32, i32, i32
  }
  func.func @transform_9(%arg0: i32, %arg1: i32) -> (i32, i32, i32, i32) {
    %c0_i32 = arith.constant 0 : i32
    %c0_i32_0 = arith.constant 0 : i32
    %c0_i32_1 = arith.constant 0 : i32
    return %arg0, %arg1, %c0_i32, %c0_i32_0 : i32, i32, i32, i32
  }
}

</mosaic_0001>

<bundles_post_ra>
// kernel: tpu_custom_call.1
= control target key start
LH: loop header
LB: loop body
LE: loop exit
PB: predicated region body
PF: predicated region fallthrough
CT: control target
= control target key end

     0   :  { %s2230_s0 = inlined_call_operand.hbm [shape: bf16[2,8,32], index: 0, kind: input, shape index: {}]   ;;  %s2231_s1 = inlined_call_operand.vmem [shape: bf16[1,32,32], index: 1, kind: input, shape index: {}]   ;;  %s2232_s2 = inlined_call_operand.vmem [shape: f32[1,32,1], index: 2, kind: input, shape index: {}]   ;;  %s2233_s3 = inlined_call_operand.vmem [shape: bf16[4,8,32], index: 3, kind: input, shape index: {}]   ;;  %s2234_s4 = inlined_call_operand.vmem [shape: f32[4,1,8], index: 4, kind: input, shape index: {}]   ;;  %s2235_s5 = inlined_call_operand.hbm [shape: bf16[4,8,32], index: 5, kind: input, shape index: {}]   ;;  %s2236_s6 = inlined_call_operand.vmem [shape: f32[4,1,8], index: 6, kind: input, shape index: {}]   ;;  %s2237_s7 = inlined_call_operand.hbm [shape: bf16[2,4,8,8], index: 7, kind: output, shape index: {0}]   ;;  %s2238_s8 = inlined_call_operand.hbm [shape: bf16[2,4,8,8], index: 8, kind: output, shape index: {1}]   ;;  %s2239_s9 = inlined_call_operand.hbm [shape: bf16[2,4,8,8], index: 9, kind: output, shape index: {2}]  }
   0x1   :  { %2247 = sst [smem:[#allocation19_spill]] %s2235_s5 }
   0x2   :  { %2248 = sst [smem:[#allocation20_spill]] %s2239_s9 }
   0x3   :  { %15 = vsyncpa [#allocation3], 0 }
   0x4   :  { %17 = vsyncpa [#allocation3 + $0x1], 0 }
   0x5   :  { %18 = vsyncpa [#allocation6], 0 }
   0x6   :  { %19 = vsyncpa [#allocation4], 0 }
   0x7   :  { %21 = vsyncpa [#allocation4 + $0x1], 0 }
   0x8   :  { %22 = vsyncpa [#allocation9], 0 }
   0x9   :  { %24 = vsyncpa [#allocation9 + $0x1], 0  ;;  %s1848_s30 = smov 0   ;;  %s1850_s10 = smov 0  }
   0xa   :  { %s1852_s11 = smov 0   ;;  %s1854_s12 = smov 0  }
   0xb   :  { %s1856_s13 = smov 0   ;;  %s1858_s14 = smov 0  }
   0xc LB: > { %2249 = sst [smem:[#allocation15_spill]] %s1764_s30  ;;  %s1879_s15 = sadd.s32 4294967295, %s1784_s14   ;;  %s1784_s14 = sphi %s1858_s14, %s30_s14   ;;  %s1780_s13 = sphi %s1856_s13, %s2271_s13   ;;  %s1776_s12 = sphi %s1854_s12, %s2270_s12   ;;  %s1772_s11 = sphi %s1852_s11, %s2274_s11   ;;  %s1768_s10 = sphi %s1850_s10, %s2273_s10   ;;  %s1764_s30 = sphi %s1848_s30, %s2272_s30  }
   0xd   : > { %2250 = sst [smem:[#allocation16_spill]] %s1780_s13  ;;  %s2240_s16 = sadd.s32 4294967294, %s1784_s14  }
   0xe   : > { %p62_p0 = scmp.ne.s32.totalorder %s1768_s10, %s1764_s30  ;;  %p2246_p1 = scmp.eq.s32.totalorder %s1879_s15, 0 }
   0xf   : > { %p250_p3 = scmp.eq.s32.totalorder %s2240_s16, 1  ;;  %p1357_p5 = scmp.ge.s32.totalorder %s1784_s14, 1 }
  0x10   : > { %p1890_p4 = por %p2246_p1, %p62_p0  ;;  %p313_p7 = scmp.lt.s32.totalorder %s1784_s14, 3 }
  0x11   : > { %p1895_p6 = por %p250_p3, %p62_p0  ;;  %s1786_s20 = smov [#allocation5]  }
  0x12   : > { %p1900_p8 = pnand %p1357_p5, %p313_p7  ;;  %s361_s21 = sshll.u32 %s1786_s20, 4  ;;  %s362_s21 = int_to_ptr.vmem [resolvable:$true] %s361_s21 }
  0x13   : > { %s2252_s18 = scalar_select %p1895_p6, 1, 0 }
  0x14   : > { %p1508_p9 = pneg %p1900_p8  ;;  %s42_s23 = sadd.s32 1, %s1780_s13 }
  0x15   : > { %2253 = sst [smem:[#allocation17_spill]] %s2252_s18  ;;  %s1601_s24 = scalar_lea.vmem %s362_s21, 256 }
  0x16   : > { %p1909_p11 = pnand %p1508_p9, %p2246_p1  ;;  %p1602_p13 = scmp.ne.s32.totalorder %s362_s21, %s1601_s24 }
  0x17   : > { %p1609_p5 = scmp.lt.s32.totalorder %s362_s21, %s362_s21  ;;  %p1610_p7 = scmp.lt.s32.totalorder %s1601_s24, %s1601_s24 }
  0x18   : > { %p1592_p12 = pneg %p1909_p11 }
  0x19   : > { %p1611_p2 = por %p1610_p7, %p1609_p5 }
  0x1a   : > { %p1604_p0 = pnand %p1602_p13, %p1592_p12 }
  0x1c   : > { %p1605_p3 = pneg %p1604_p0 }
  0x1e   : > { %p1612_p6 = pnand %p1611_p2, %p1605_p3 }
  0x20   : > { %1615 = shalt.err (!%p1612_p6)
}
  0x21   : > { %s1787_s25 = smov 64   ;;  %s1788_s26 = smov 4  }
  0x22   : > { %s2256_s5 = sld [smem:[#allocation19_spill]]  ;;  %p44_p2 = scmp.ge.s32.totalorder %s42_s23, 2 }
  0x23   : > { %s49_s29 = sadd.s32 1, %s1772_s11  ;;  %p56_p6 = scmp.ne.s32.totalorder %s1772_s11, %s1768_s10 }
  0x24   : > { %p57_p9 = scmp.eq.s32.totalorder %s1784_s14, 0  ;;  %s2276_s23 = smov (%p44_p2, %s42_s23), 0 }
  0x25   : > { %2257 = sst [smem:[#allocation18_spill]] %s2276_s23  ;;  %p2259_p13 = scmp.eq.s32.totalorder %s1879_s15, 1 }
  0x26   : > { %p1927_p12 = por %p57_p9, %p56_p6  ;;  %s46_s22 = ssub.s32 %s1780_s13, %s2276_s23 }
  0x27   : > { %p1933_p0 = por %p2259_p13, %p56_p6  ;;  %p1527_p3 = scmp.lt.s32.totalorder %s1784_s14, 2 }
  0x28   : > { %1511 = dma.hbm_to_vmem [thread:$0]  (!%p1909_p11), %s2256_s5, 256, %s362_s21, [#allocation6], %s1787_s25, %s1787_s25, %s1788_s26  }
  0x29   : > { %p47_p11 = scmp.eq.s32.totalorder %s46_s22, 0  ;;  %s383_s21 = sand.u32 1, %s1772_s11  }
  0x2a   : > { %s1365_s25 = sshll.u32 %s383_s21, 2  ;;  %s1366_s27 = sshll.u32 %s1780_s13, 6 }
  0x2b   : > { %s1942_s26 = scalar_select %p47_p11, %s1772_s11, %s49_s29  }
  0x2c   : > { %s392_s5 = scalar_lea.hbm %s2230_s0, %s1366_s27  ;;  %s387_s18 = scalar_lea.vmem [#allocation2], %s1365_s25 }
  0x2d   : > { %s394_s30 = sshll.u32 %s387_s18, 4  ;;  %p1950_p5 = pnand %p1527_p3, %p1927_p12  ;;  %s395_s30 = int_to_ptr.vmem [resolvable:$true] %s394_s30 }
  0x2e   : > { %s384_s23 = scalar_lea.sflag [#allocation3], %s383_s21  ;;  %s1629_s22 = scalar_lea.vmem %s395_s30, 64 }
  0x2f   : > { %p1618_p7 = pneg %p1950_p5  ;;  %p1630_p2 = scmp.ne.s32.totalorder %s395_s30, %s1629_s22 }
  0x30   : > { %s1789_s29 = smov [#allocation2]  }
  0x31   : > { %p1632_p6 = pnand %p1630_p2, %p1618_p7  ;;  %s1634_s13 = sshll.u32 %s1789_s29, 4  ;;  %s1635_s13 = int_to_ptr.vmem [resolvable:$false] %s1634_s13 }
  0x32   : > { %s1636_s16 = scalar_lea.vmem %s1635_s13, 128  ;;  %p1637_p13 = scmp.lt.s32.totalorder %s395_s30, %s1635_s13 }
  0x33   : > { %p1633_p9 = pneg %p1632_p6  ;;  %p1638_p11 = scmp.lt.s32.totalorder %s1636_s16, %s1629_s22 }
  0x35   : > { %p1639_p10 = por %p1638_p11, %p1637_p13 }
  0x37   : > { %p1640_p1 = pnand %p1639_p10, %p1633_p9 }
  0x39   : > { %1643 = shalt.err (!%p1640_p1)
}
  0x3a   : > { %1515 = dma.hbm_to_vmem [thread:$0]  (!%p1950_p5), %s392_s5, 64, %s395_s30, %s384_s23  }
  0x3b   : > { %403 = sbr.rel (%p1900_p8) target bundleno = 347 (0x15b), region = 48  ;;  %s1961_s18 = sand.u32 (!%p1900_p8), 1, %s1768_s10  }
  0x3c   : > { %s1368_s20 = sshll.u32 (!%p1900_p8), %s1961_s18, 2  ;;  %s406_s21 = scalar_lea.sflag (!%p1900_p8), [#allocation3], %s1961_s18 }
  0x3d   : > { %s409_s25 = scalar_lea.vmem (!%p1900_p8), [#allocation2], %s1368_s20 }
  0x40   : > { %1747 = dma.done.wait (%p1890_p4), %s406_s21, 64  }
  0x41   : > { %1749 = vsyncadd (%p1890_p4), %s406_s21, 4294967232  ;;  %p2262_p1 = scmp.eq.s32.totalorder %s1879_s15, 0 }
  0x43   : > { %1751 = dma.done.wait (%p2262_p1), [#allocation6], 256   ;;  %p2263_p10 = pmov %p2262_p1 }
  0x44   : > { %v1790_v0 = vmov 0.0   ;;  %vm1791_vm0 = vmmov 0   ;;  %v1792_v1 = vmov 0   ;;  %vm551_vm1 = vcmask 261120   ;;  %v512_v2 = vld [vmem:[%s409_s25] sm:$0xf] }
  0x45   : > { %1753 = vsyncadd (%p2263_p10), [#allocation6], 4294967040  ;;  %1447 = vmatprep.subr.bf16.mxu1 %v1790_v0  ;;  %1449 = vmatprep.mubr.msk.bf16.mxu1 %vm1791_vm0, %v1790_v0  ;;  %v619_v3 = vld [vmem:[%s2233_s3] sm:$0xf]  ;;  %v559_v4 = vsel %vm551_vm1, %v512_v2, 0  ;;  %v519_v7 = vld [vmem:[%s2232_s2 + $0x10] sm:$0xff] }
  0x46   : > { %1587 = vset.pattern.permute.xlu1 %v1792_v1  ;;  %1586 = vset.pattern.permute.xlu0 %v1792_v1  ;;  %v628_v5 = vsel %vm551_vm1, %v619_v3, 0  ;;  %v1588_v6 = vld [vmem:[%s2231_s1] sm:$0xff]   ;;  %v670_v8 = vld [vmem:[#allocation5] sm:$0xf]  ;;  %v520_v12 = vld [vmem:[%s2232_s2 + $0x18] sm:$0xff]  ;;  %s2051_s27 = sshll.u32 %s1961_s18, 4 }
  0x47   : > { %1495 = vmatprep.subr.msk.bf16.mxu0 %vm551_vm1, %v512_v2  ;;  %1448 = vmatpush3.bf16.xpose.msra.mxu1 %v628_v5  ;;  %v1381_v9 = vld [vmem:[%s2233_s3 + $0x4] sm:$0xf]  ;;  %v1589_v10 = vld [vmem:[%s2231_s1 + $0x8] sm:$0xff]   ;;  %v679_v13 = vsel %vm551_vm1, %v670_v8, 0  ;;  %v891_v20 = vld [vmem:[#allocation5 + $0x8] sm:$0xf] }
  0x48   : > { %1442 = vmatpush3.bf16.xpose.msra.mxu0 %v559_v4  ;;  %1443 = vmatprep.mubr.msk.bf16.mxu0 %vm551_vm1, %v1588_v6  ;;  %v517_v11 = vld [vmem:[%s2232_s2] sm:$0xff]  ;;  %v736_v14 = vsel %vm551_vm1, %v1381_v9, 0  ;;  %v518_v15 = vld [vmem:[%s2232_s2 + $0x8] sm:$0xff]  ;;  %v901_v22 = vsel %vm551_vm1, %v891_v20, 0  ;;  %v1003_v24 = vld [vmem:[#allocation5 + $0xc] sm:$0xf] }
  0x49   : > { %1453 = vmatprep.subr.bf16.mxu0 %v1790_v0  ;;  %1459 = vmatprep.subr.bf16.mxu1 %v1790_v0  ;;  %v779_v16 = vld [vmem:[#allocation5 + $0x4] sm:$0xf]  ;;  %v1390_v17 = vld [vmem:[%s2233_s3 + $0x8] sm:$0xf]  ;;  %v1013_v25 = vsel %vm551_vm1, %v1003_v24, 0  ;;  %vm614_vm2 = vcmask 60416  }
  0x4a   : > { %533 = vperm.xlu1 %1587, %v519_v7   ;;  %523 = vperm.xlu0 %1586, %v517_v11   ;;  %v789_v18 = vsel %vm551_vm1, %v779_v16, 0  ;;  %v848_v19 = vsel %vm551_vm1, %v1390_v17, 0  ;;  %v1399_v21 = vld [vmem:[%s2233_s3 + $0xc] sm:$0xf]  ;;  %v1377_v28 = vld [vmem:[%s2234_s4] ss:$0 sm:$0xff] }
  0x4b   : > { %v960_v23 = vsel %vm551_vm1, %v1399_v21, 0  ;;  %s473_s28 = scalar_lea.vmem [#allocation8], %s2051_s27  ;;  %s2056_s29 = scalar_lea.vmem [#allocation7], %s2051_s27  ;;  %v1379_v45 = vld [vmem:[%s2236_s6] ss:$0 sm:$0xff] }
  0x4c   : > { %s1105_s22 = sshll.u32 %s473_s28, 4  ;;  %s1066_s16 = sand.u32 1, %s1879_s15   ;;  %v1383_v47 = vld [vmem:[%s2234_s4 + $0x1] ss:$0 sm:$0xff]  ;;  %s2070_s22 = int_to_ptr.vmem [resolvable:$true] %s1105_s22 }
  0x4d   : > { %s2068_s9 = sshll.u32 %s1776_s12, 8  ;;  %s2081_s13 = scalar_lea.sflag [#allocation9], %s1066_s16 }
  0x4e   : > { %538 = vperm.xlu1 %1587, %v520_v12   ;;  %1450 = vmatmul.mubr.msk.bf16.vlgmr.msra.gmra.mxu1 %vm551_vm1, %v512_v2  ;;  %s2078_s30 = scalar_lea.hbm %s2238_s8, %s2068_s9  ;;  %s1644_s17 = scalar_lea.vmem %s2070_s22, 256 }
  0x4f   : > { %1444 = vmatmul.mubr.msk.bf16.vlgmr.msra.gmra.mxu0 %vm551_vm1, %v1589_v10  ;;  %1460 = vmatpush3.bf16.xpose.msra.mxu1 %v736_v14  ;;  %p1645_p4 = scmp.ne.s32.totalorder %s2070_s22, %s1644_s17  ;;  %s1793_s19 = smov [#allocation8]  }
  0x50   : > { %1454 = vmatpush3.bf16.xpose.msra.mxu0 %v679_v13  ;;  %1455 = vmatprep.mubr.msk.bf16.mxu0 %vm1791_vm0, %v1790_v0  ;;  %s1648_s23 = sshll.u32 %s1793_s19, 4  ;;  %s1649_s23 = int_to_ptr.vmem [resolvable:$false] %s1648_s23 }
  0x51   : > { %1465 = vmatprep.subr.bf16.mxu0 %v1790_v0  ;;  %1461 = vmatprep.mubr.msk.bf16.mxu1 %vm1791_vm0, %v1790_v0  ;;  %p1646_p8 = pnand %p1645_p4, %p1933_p0  ;;  %s1650_s20 = scalar_lea.vmem %s1649_s23, 512 }
  0x52   : > { %1471 = vmatprep.subr.bf16.mxu1 %v1790_v0  ;;  %528 = vperm.xlu0 %1586, %v518_v15   ;;  %p1651_p3 = scmp.lt.s32.totalorder %s2070_s22, %s1649_s23  ;;  %p1652_p5 = scmp.lt.s32.totalorder %s1650_s20, %s1644_s17 }
  0x53   : > { %p1647_p12 = pneg %p1646_p8 }
  0x54   : > { %p1653_p7 = por %p1652_p5, %p1651_p3 }
  0x56   : > { %1462 = vmatmul.mubr.msk.bf16.vlgmr.msra.gmra.mxu1 %vm551_vm1, %v512_v2  ;;  %p1654_p2 = pnand %p1653_p7, %p1647_p12 }
  0x57   : > { %1456 = vmatmul.mubr.msk.bf16.vlgmr.msra.gmra.mxu0 %vm551_vm1, %v512_v2  ;;  %1472 = vmatpush3.bf16.xpose.msra.mxu1 %v848_v19 }
  0x58   : > { %1466 = vmatpush3.bf16.xpose.msra.mxu0 %v789_v18  ;;  %1467 = vmatprep.mubr.msk.bf16.mxu0 %vm1791_vm0, %v1790_v0 }
  0x59   : > { %1477 = vmatprep.subr.bf16.mxu0 %v1790_v0  ;;  %1473 = vmatprep.mubr.msk.bf16.mxu1 %vm1791_vm0, %v1790_v0 }
  0x5a   : > { %1483 = vmatprep.subr.bf16.mxu1 %v1790_v0 }
  0x5e   : > { %1474 = vmatmul.mubr.msk.bf16.vlgmr.msra.gmra.mxu1 %vm551_vm1, %v512_v2 }
  0x5f   : > { %1468 = vmatmul.mubr.msk.bf16.vlgmr.msra.gmra.mxu0 %vm551_vm1, %v512_v2  ;;  %1484 = vmatpush3.bf16.xpose.msra.mxu1 %v960_v23 }
  0x60   : > { %1478 = vmatpush3.bf16.xpose.msra.mxu0 %v901_v22  ;;  %1479 = vmatprep.mubr.msk.bf16.mxu0 %vm1791_vm0, %v1790_v0 }
  0x61   : > { %1489 = vmatprep.subr.bf16.mxu0 %v1790_v0  ;;  %1485 = vmatprep.mubr.msk.bf16.mxu1 %vm1791_vm0, %v1790_v0 }
  0x66   : > { %1486 = vmatmul.mubr.msk.bf16.vlgmr.msra.gmra.mxu1 %vm551_vm1, %v512_v2 }
  0x67   : > { %1480 = vmatmul.mubr.msk.bf16.vlgmr.msra.gmra.mxu0 %vm551_vm1, %v512_v2 }
  0x68   : > { %1490 = vmatpush3.bf16.xpose.msra.mxu0 %v1013_v25  ;;  %1491 = vmatprep.mubr.msk.bf16.mxu0 %vm1791_vm0, %v1790_v0 }
  0x6f   : > { %1492 = vmatmul.mubr.msk.bf16.vlgmr.msra.gmra.mxu0 %vm551_vm1, %v512_v2 }
  0xc5   : > { %v534_v26 = vpop.permute.xlu1 %533  ;;  %v524_v27 = vpop.permute.xlu0 %523 }
  0xc9   : > { %v539_v33 = vpop.permute.xlu1 %538 }
  0xcd   : > { %v529_v39 = vpop.permute.xlu0 %528 }
 0x10e   : > { %v664_v30 = vpop.f32.mrf.mxu1 }
 0x10f   : > { %v1445_v29 = vpop.f32.mrf.mxu0  ;;  %v665_v32 = vadd.f32 %v1377_v28, %v664_v30 }
 0x110   : > { %v604_v31 = vadd.f32 %v1445_v29, %v534_v26  ;;  %v1451_v35 = vpop.f32.mrf.mxu1 }
 0x111   : > { %v595_v34 = vpop.f32.mrf.mxu0  ;;  %v721_v38 = vpack.c.bf16 %v665_v32, %v665_v32 }
 0x112   : > { %v612_v36 = vpack.c.bf16 %v604_v31, %v604_v31  ;;  %v596_v37 = vadd.f32 %v595_v34, %v524_v27  ;;  %v667_v41 = vpop.f32.mrf.mxu1 }
 0x113   : > { %v1446_v40 = vpop.f32.mrf.mxu0  ;;  %722 = vst.msk [vmem:[%s2056_s29] sm:$0xf] %vm614_vm2, %v721_v38 }
 0x114   : > { %617 = vst.msk [vmem:[%s473_s28 + $0x8] sm:$0xf] %vm614_vm2, %v612_v36  ;;  %v610_v42 = vpack.c.bf16 %v596_v37, %v596_v37  ;;  %v607_v43 = vadd.f32 %v1446_v40, %v539_v33  ;;  %v1452_v46 = vpop.f32.mrf.mxu1 }
 0x115   : > { %v598_v44 = vpop.f32.mrf.mxu0 }
 0x116   : > { %615 = vst.msk [vmem:[%s473_s28] sm:$0xf] %vm614_vm2, %v610_v42  ;;  %v613_v48 = vpack.c.bf16 %v607_v43, %v607_v43  ;;  %v599_v49 = vadd.f32 %v598_v44, %v529_v39  ;;  %v772_v51 = vpop.f32.mrf.mxu1 }
 0x117   : > { %v715_v50 = vpop.f32.mrf.mxu0  ;;  %v773_v54 = vadd.f32 %v1383_v47, %v772_v51 }
 0x118   : > { %618 = vst.msk [vmem:[%s473_s28 + $0xc] sm:$0xf] %vm614_vm2, %v613_v48  ;;  %v611_v52 = vpack.c.bf16 %v599_v49, %v599_v49  ;;  %v716_v53 = vadd.f32 %v1379_v45, %v715_v50  ;;  %v1463_v56 = vpop.f32.mrf.mxu1 }
 0x119   : > { %v1457_v55 = vpop.f32.mrf.mxu0  ;;  %v831_v58 = vpack.c.bf16 %v773_v54, %v773_v54 }
 0x11a   : > { %616 = vst.msk [vmem:[%s473_s28 + $0x4] sm:$0xf] %vm614_vm2, %v611_v52  ;;  %v723_v57 = vpack.c.bf16 %v716_v53, %v716_v53  ;;  %v775_v60 = vpop.f32.mrf.mxu1 }
 0x11b   : > { %v718_v59 = vpop.f32.mrf.mxu0 }
 0x11c   : > { %1657 = shalt.err (!%p1654_p2)
}
 0x11d   : > { %s1658_s28 = scalar_lea.hbm %s2078_s30, 256  ;;  %s1662_s25 = scalar_lea.hbm %s2238_s8, 512 }
 0x11e   : > { %p1659_p6 = scmp.ne.s32.totalorder %s2078_s30, %s1658_s28  ;;  %p1663_p11 = scmp.lt.s32.totalorder %s2078_s30, %s2238_s8 }
 0x11f   : > { %p1664_p1 = scmp.lt.s32.totalorder %s1662_s25, %s1658_s28 }
 0x120   : > { %p1660_p9 = pnand %p1659_p6, %p1933_p0 }
 0x121   : > { %p1665_p10 = por %p1664_p1, %p1663_p11 }
 0x122   : > { %p1661_p13 = pneg %p1660_p9 }
 0x124   : > { %p1666_p4 = pnand %p1665_p10, %p1661_p13 }
 0x126   : > { %1669 = shalt.err (!%p1666_p4)
}
 0x127   : > { %s1794_s12 = smov 64   ;;  %s1795_s17 = smov 4   ;;  %1388 = vst.msk [vmem:[%s2056_s29 + $0x4] sm:$0xf] %vm614_vm2, %v831_v58  ;;  %v1458_v61 = vpop.f32.mrf.mxu0  ;;  %v1386_v62 = vld [vmem:[%s2236_s6 + $0x1] ss:$0 sm:$0xff]  ;;  %v1464_v63 = vpop.f32.mrf.mxu1 }
 0x128   : > { %1503 = dma.vmem_to_hbm [thread:$0]  (%p1933_p0), %s2070_s22, 256, %s2078_s30, %s2081_s13, %s1794_s12, %s1794_s12, %s1795_s17  }
 0x129   : > { %s2108_s19 = scalar_lea.vmem [#allocation10], %s2051_s27  ;;  %v1392_v0 = vld [vmem:[%s2234_s4 + $0x2] ss:$0 sm:$0xff]  ;;  %v825_v1 = vpop.f32.mrf.mxu0  ;;  %v884_v2 = vpop.f32.mrf.mxu1  ;;  %v1401_v14 = vld [vmem:[%s2234_s4 + $0x3] ss:$0 sm:$0xff]  ;;  %s1087_s25 = sshll.u32 %s2056_s29, 4  ;;  %s2131_s25 = int_to_ptr.vmem [resolvable:$true] %s1087_s25 }
 0x12a   : > { %724 = vst.msk [vmem:[%s2108_s19] sm:$0xf] %vm614_vm2, %v723_v57  ;;  %v826_v3 = vadd.f32 %v1386_v62, %v825_v1  ;;  %v885_v4 = vadd.f32 %v1392_v0, %v884_v2  ;;  %v1395_v12 = vld [vmem:[%s2236_s6 + $0x2] ss:$0 sm:$0xff]  ;;  %s2137_s23 = scalar_lea.hbm %s2237_s7, %s2068_s9  ;;  %v1404_v25 = vld [vmem:[%s2236_s6 + $0x3] ss:$0 sm:$0xff] }
 0x12b   : > { %v1469_v5 = vpop.f32.mrf.mxu0  ;;  %v1475_v6 = vpop.f32.mrf.mxu1  ;;  %s1062_s16 = scalar_lea.sflag [#allocation4], %s1961_s18  ;;  %s1670_s27 = scalar_lea.vmem %s2131_s25, 256 }
 0x12c   : > { %v834_v7 = vpack.c.bf16 %v826_v3, %v826_v3  ;;  %v943_v8 = vpack.c.bf16 %v885_v4, %v885_v4  ;;  %p1671_p8 = scmp.ne.s32.totalorder %s2131_s25, %s1670_s27  ;;  %s1796_s22 = smov [#allocation7]  }
 0x12d   : > { %v828_v9 = vpop.f32.mrf.mxu0  ;;  %v887_v10 = vpop.f32.mrf.mxu1  ;;  %s1674_s30 = sshll.u32 %s1796_s22, 4  ;;  %s1675_s30 = int_to_ptr.vmem [resolvable:$false] %s1674_s30 }
 0x12e   : > { %1389 = vst.msk [vmem:[%s2108_s19 + $0x4] sm:$0xf] %vm614_vm2, %v834_v7  ;;  %1397 = vst.msk [vmem:[%s2056_s29 + $0x8] sm:$0xf] %vm614_vm2, %v943_v8  ;;  %p1672_p12 = pnand %p1671_p8, %p1933_p0  ;;  %s1676_s21 = scalar_lea.vmem %s1675_s30, 512 }
 0x12f   : > { %v1470_v11 = vpop.f32.mrf.mxu0  ;;  %v1476_v13 = vpop.f32.mrf.mxu1  ;;  %p1677_p5 = scmp.lt.s32.totalorder %s2131_s25, %s1675_s30  ;;  %p1678_p7 = scmp.lt.s32.totalorder %s1676_s21, %s1670_s27 }
 0x130   : > { %p1673_p3 = pneg %p1672_p12 }
 0x131   : > { %v937_v15 = vpop.f32.mrf.mxu0  ;;  %v996_v16 = vpop.f32.mrf.mxu1  ;;  %p1679_p2 = por %p1678_p7, %p1677_p5 }
 0x132   : > { %v938_v17 = vadd.f32 %v1395_v12, %v937_v15  ;;  %v997_v18 = vadd.f32 %v1401_v14, %v996_v16 }
 0x133   : > { %v1481_v19 = vpop.f32.mrf.mxu0  ;;  %v1487_v20 = vpop.f32.mrf.mxu1  ;;  %p1680_p6 = pnand %p1679_p2, %p1673_p3 }
 0x134   : > { %v946_v21 = vpack.c.bf16 %v938_v17, %v938_v17  ;;  %v1055_v22 = vpack.c.bf16 %v997_v18, %v997_v18 }
 0x135   : > { %v940_v23 = vpop.f32.mrf.mxu0  ;;  %v999_v24 = vpop.f32.mrf.mxu1 }
 0x136   : > { %1398 = vst.msk [vmem:[%s2108_s19 + $0x8] sm:$0xf] %vm614_vm2, %v946_v21  ;;  %1406 = vst.msk [vmem:[%s2056_s29 + $0xc] sm:$0xf] %vm614_vm2, %v1055_v22 }
 0x137   : > { %v1482_v26 = vpop.f32.mrf.mxu0  ;;  %v1488_v27 = vpop.f32.mrf.mxu1 }
 0x138   : > { %1683 = shalt.err (!%p1680_p6)
}
 0x139   : > { %s1684_s29 = scalar_lea.hbm %s2137_s23, 256  ;;  %s1688_s15 = scalar_lea.hbm %s2237_s7, 512 }
 0x13a   : > { %p1685_p9 = scmp.ne.s32.totalorder %s2137_s23, %s1684_s29  ;;  %p1689_p1 = scmp.lt.s32.totalorder %s2137_s23, %s2237_s7 }
 0x13b   : > { %p1690_p10 = scmp.lt.s32.totalorder %s1688_s15, %s1684_s29 }
 0x13c   : > { %p1686_p13 = pnand %p1685_p9, %p1933_p0 }
 0x13d   : > { %p1691_p4 = por %p1690_p10, %p1689_p1 }
 0x13e   : > { %p1687_p11 = pneg %p1686_p13 }
 0x140   : > { %p1692_p8 = pnand %p1691_p4, %p1687_p11 }
 0x142   : > { %1695 = shalt.err (!%p1692_p8)
}
 0x143   : > { %1502 = dma.vmem_to_hbm [thread:$0]  (%p1933_p0), %s2131_s25, 256, %s2137_s23, %s1062_s16, %s1794_s12, %s1794_s12, %s1795_s17   ;;  %v1049_v28 = vpop.f32.mrf.mxu0 }
 0x144   : > { %s1123_s27 = sshll.u32 %s2108_s19, 4  ;;  %v1050_v29 = vadd.f32 %v1404_v25, %v1049_v28  ;;  %s2264_s21 = sld [smem:[#allocation20_spill]]  ;;  %s2171_s27 = int_to_ptr.vmem [resolvable:$true] %s1123_s27 }
 0x145   : > { %v1493_v30 = vpop.f32.mrf.mxu0  ;;  %s1696_s25 = scalar_lea.vmem %s2171_s27, 256  ;;  %s1797_s23 = smov [#allocation10]  }
 0x146   : > { %v1058_v31 = vpack.c.bf16 %v1050_v29, %v1050_v29  ;;  %p1697_p12 = scmp.ne.s32.totalorder %s2171_s27, %s1696_s25  ;;  %s1700_s16 = sshll.u32 %s1797_s23, 4  ;;  %s1701_s16 = int_to_ptr.vmem [resolvable:$false] %s1700_s16 }
 0x147   : > { %v1052_v32 = vpop.f32.mrf.mxu0  ;;  %s1702_s18 = scalar_lea.vmem %s1701_s16, 512  ;;  %p1703_p7 = scmp.lt.s32.totalorder %s2171_s27, %s1701_s16 }
 0x148   : > { %1407 = vst.msk [vmem:[%s2108_s19 + $0xc] sm:$0xf] %vm614_vm2, %v1058_v31  ;;  %p1698_p3 = pnand %p1697_p12, %p1933_p0  ;;  %p1704_p2 = scmp.lt.s32.totalorder %s1702_s18, %s1696_s25 }
 0x149   : > { %v1494_v33 = vpop.f32.mrf.mxu0 }
 0x14a   : > { %s2177_s29 = scalar_lea.hbm %s2264_s21, %s2068_s9  ;;  %p1699_p5 = pneg %p1698_p3 }
 0x14b   : > { %p1705_p6 = por %p1704_p2, %p1703_p7 }
 0x14d   : > { %p1706_p9 = pnand %p1705_p6, %p1699_p5 }
 0x14f   : > { %1709 = shalt.err (!%p1706_p9)
}
 0x150   : > { %s1710_s9 = scalar_lea.hbm %s2177_s29, 256  ;;  %s1714_s15 = scalar_lea.hbm %s2264_s21, 512 }
 0x151   : > { %p1711_p13 = scmp.ne.s32.totalorder %s2177_s29, %s1710_s9  ;;  %p1715_p10 = scmp.lt.s32.totalorder %s2177_s29, %s2264_s21 }
 0x152   : > { %p1716_p4 = scmp.lt.s32.totalorder %s1714_s15, %s1710_s9 }
 0x153   : > { %p1712_p11 = pnand %p1711_p13, %p1933_p0 }
 0x154   : > { %p1717_p8 = por %p1716_p4, %p1715_p10 }
 0x155   : > { %p1713_p1 = pneg %p1712_p11 }
 0x157   : > { %p1718_p12 = pnand %p1717_p8, %p1713_p1 }
 0x159   : > { %1721 = shalt.err (!%p1718_p12)
}
 0x15a   : > { %1504 = dma.vmem_to_hbm [thread:$0]  (%p1933_p0), %s2171_s27, 256, %s2177_s29, %s2081_s13, %s1794_s12, %s1794_s12, %s1795_s17  }
 0x15b PF: > { %s2265_s22 = sld [smem:[#allocation15_spill]]  ;;  %p2268_p5 = scmp.ge.s32.totalorder %s1784_s14, 2 }
 0x15c   : > { %s2266_s30 = sld [smem:[#allocation17_spill]] }
 0x161   : > { %s1138_s25 = sand.u32 1, %s2265_s22  }
 0x162   : > { %p2267_p3 = scmp.ne.s32.totalorder %s2266_s30, 0  ;;  %s1139_s23 = scalar_lea.sflag [#allocation4], %s1138_s25 }
 0x164   : > { %p1517_p7 = pnand %p2268_p5, %p2267_p3 }
 0x166   : > { %p1518_p2 = pneg %p1517_p7 }
 0x168   : > { %1755 = dma.done.wait (%p1518_p2), %s1139_s23, 256  }
 0x169   : > { %1757 = vsyncadd (%p1518_p2), %s1139_s23, 4294967040  ;;  %s2269_s24 = sadd.s32 4294967294, %s1784_s14  }
 0x16a   : > { %s1147_s16 = sand.u32 1, %s2269_s24  }
 0x16b   : > { %s1148_s18 = scalar_lea.sflag [#allocation9], %s1147_s16 }
 0x16c   : > { %1759 = dma.done.wait (%p1518_p2), %s1148_s18, 512  }
 0x16d   : > { %1761 = vsyncadd (%p1518_p2), %s1148_s18, 4294966784  ;;  %s30_s14 = sadd.s32 1, %s1784_s14   ;;  %s2270_s12 = sld [smem:[#allocation16_spill]] }
 0x16e   : > { %p27_p0 = scmp.ge.s32.totalorder %s30_s14, 4   ;;  %s2271_s13 = sld [smem:[#allocation18_spill]] }
 0x16f   : > { %s2272_s30 = smov %s1768_s10  ;;  %s2273_s10 = smov %s1772_s11 }
 0x170   : > { %s2274_s11 = smov %s1942_s26  ;;  %29 = sbr.rel (!%p27_p0) target bundleno = 12 (0xc), region = 163 }
 0x175   :  { %1162 = vsyncpa [#allocation3], 1 }
 0x176   :  { %1164 = vsyncpa [#allocation3 + $0x1], 1 }
 0x177   :  { %1165 = vsyncpa [#allocation6], 1 }
 0x178   :  { %1166 = vsyncpa [#allocation4], 1 }
 0x179   :  { %1168 = vsyncpa [#allocation4 + $0x1], 1 }
 0x17a   :  { %1169 = vsyncpa [#allocation9], 1 }
 0x17b   :  { %1171 = vsyncpa [#allocation9 + $0x1], 1 }

</bundles_post_ra>
